<compile_context>
chip_gen: v7x
topology: tpu7x:2x2x1
jax: 0.10.0
libtpu: 0.0.40
codegen_flags: <defaults>
</compile_context>

<pallas_src>
from functools import partial

import jax
import jax.numpy as jnp
from jax import lax
from jax.experimental import pallas as pl
from jax.experimental.pallas import tpu as pltpu


def _round_up(a, m):
    return (a + m - 1) // m * m


def _gru_kernel(lens_ref, x_ref, wih_t_ref, whh_t_ref, bih_ref, bhh_ref,
                out_ref, hN_ref, gi_scratch, *, use_mask, unroll):
    t_blk, b_blk, in_dim = x_ref.shape
    Hp = hN_ref.shape[-1]
    GP = 3 * Hp
    tb = pl.program_id(1)

    # h0 = zeros (PyTorch default when init_hiddens is None); hN_ref is the
    # resident cross-time-block hidden-state carrier.
    @pl.when(tb == 0)
    def _():
        hN_ref[...] = jnp.zeros_like(hN_ref)

    # ---- hoisted input projection for the whole time block (one big MXU op).
    x2 = x_ref[...].reshape(t_blk * b_blk, in_dim)
    gi = jnp.dot(x2, wih_t_ref[...], preferred_element_type=jnp.float32)
    gi = gi + bih_ref[...]                                  # fold b_ih once
    gi_scratch[...] = gi.reshape(t_blk, b_blk, GP)

    # ---- loop-invariant hoists.
    whh = whh_t_ref[...]                                    # (Hp, GP)
    bhh = jnp.broadcast_to(bhh_ref[...], (b_blk, GP))       # broadcast once
    t0 = tb * t_blk
    if use_mask:
        lens = lens_ref[...]                                # (b_blk, 1) int32

    def step(t, h_prev):
        gi_t = gi_scratch[t]                                # (b_blk, GP)
        gh = jnp.dot(h_prev, whh, preferred_element_type=jnp.float32) + bhh
        # PyTorch GRU gate order: r, z, n (each gate padded to Hp lanes).
        r = jax.nn.sigmoid(gi_t[:, 0:Hp] + gh[:, 0:Hp])
        z = jax.nn.sigmoid(gi_t[:, Hp:2 * Hp] + gh[:, Hp:2 * Hp])
        n = jnp.tanh(gi_t[:, 2 * Hp:] + r * gh[:, 2 * Hp:])
        h_new = (1.0 - z) * n + z * h_prev
        if use_mask:
            mask = (t0 + t) < lens                          # (b_blk, 1)
            h_new = jnp.where(mask, h_new, h_prev)
            out_t = jnp.where(mask, h_new, 0.0)             # packed semantics
        else:
            out_t = h_new
        out_ref[t] = out_t.astype(out_ref.dtype)
        return h_new

    h_last = lax.fori_loop(0, t_blk, step, hN_ref[...], unroll=unroll)
    hN_ref[...] = h_last


def _pack_gate_cols(w, H, Hp):
    """w: (3H, X) PyTorch-packed -> (X, 3*Hp) transposed, per-gate column pad."""
    cols = []
    for g in range(3):
        wg = jnp.transpose(w[g * H:(g + 1) * H, :])         # (X, H)
        cols.append(jnp.pad(wg, ((0, 0), (0, Hp - H))))
    return jnp.concatenate(cols, axis=1)


def _pack_gate_vec(b, H, Hp):
    """b: (3H,) -> (1, 3*Hp) with per-gate padding."""
    parts = [jnp.pad(b[g * H:(g + 1) * H], (0, Hp - H)) for g in range(3)]
    return jnp.concatenate(parts).reshape(1, 3 * Hp)


def dynamic_gru_pallas(x, w_ih, w_hh, b_ih, b_hh, input_lens=None,
                       *, t_blk=8, b_blk=None):
    """x: (B, T, I) batch_first float32.  Returns (outputs, final_hiddens, encodings).

    t_blk: timesteps per streamed grid block (VMEM is O(t_blk); halve on v7x).
    b_blk: batch rows per parallel grid block (default: whole padded batch).
    """
    B, T, I = x.shape
    H = w_hh.shape[1]
    f32 = jnp.float32

    Bp = _round_up(B, 8)            # sublane alignment (f32)
    Hp = _round_up(H, 128)          # lane alignment (lane-dense output / gates)
    GP = 3 * Hp
    Tp = _round_up(T, t_blk)
    if b_blk is None:
        b_blk = Bp
    assert Bp % b_blk == 0 and b_blk % 8 == 0

    # Static fast path: skip masking entirely when all sequences are full length.
    use_mask = (input_lens is not None) or (Tp != T)

    if input_lens is None:
        lens = jnp.full((B,), T, dtype=jnp.int32)
    else:
        lens = jnp.asarray(input_lens, jnp.int32)
        lens = jnp.where(lens == 0, 1, lens)                # input_lens[lens==0]=1
    # padded batch rows get lens=0 -> stay inert (h=0, out=0) under masking.
    lens_p = jnp.zeros((Bp, 1), jnp.int32).at[:B, 0].set(lens)

    wih_t = _pack_gate_cols(w_ih.astype(f32), H, Hp)        # (I, GP)
    whh_t = _pack_gate_cols(w_hh.astype(f32), H, Hp)        # (H, GP)
    whh_t = jnp.pad(whh_t, ((0, Hp - H), (0, 0)))           # (Hp, GP)
    bih = _pack_gate_vec(b_ih.astype(f32), H, Hp)           # (1, GP)
    bhh = _pack_gate_vec(b_hh.astype(f32), H, Hp)           # (1, GP)

    x_p = jnp.pad(x.astype(f32), ((0, Bp - B), (0, Tp - T), (0, 0)))
    x_tm = jnp.transpose(x_p, (1, 0, 2))                    # (Tp, Bp, I) time-major

    n_b = Bp // b_blk
    n_t = Tp // t_blk
    unroll = 4 if t_blk % 4 == 0 else (2 if t_blk % 2 == 0 else 1)

    kernel = partial(_gru_kernel, use_mask=use_mask, unroll=unroll)

    grid_spec = pltpu.PrefetchScalarGridSpec(
        num_scalar_prefetch=0,
        grid=(n_b, n_t),
        in_specs=[
            pl.BlockSpec((b_blk, 1), lambda b, t: (b, 0)),          # lens
            pl.BlockSpec((t_blk, b_blk, I), lambda b, t: (t, b, 0)),  # x block
            pl.BlockSpec((I, GP), lambda b, t: (0, 0)),             # W_ih^T
            pl.BlockSpec((Hp, GP), lambda b, t: (0, 0)),            # W_hh^T
            pl.BlockSpec((1, GP), lambda b, t: (0, 0)),             # b_ih
            pl.BlockSpec((1, GP), lambda b, t: (0, 0)),             # b_hh
        ],
        out_specs=(
            pl.BlockSpec((t_blk, b_blk, Hp), lambda b, t: (t, b, 0)),  # outputs
            pl.BlockSpec((b_blk, Hp), lambda b, t: (b, 0)),            # h carrier
        ),
        scratch_shapes=[pltpu.VMEM((t_blk, b_blk, GP), jnp.float32)],  # gi block
    )

    out_tm, hN = pl.pallas_call(
        kernel,
        out_shape=(jax.ShapeDtypeStruct((Tp, Bp, Hp), f32),
                   jax.ShapeDtypeStruct((Bp, Hp), f32)),
        grid_spec=grid_spec,
        compiler_params=pltpu.CompilerParams(
            dimension_semantics=("parallel", "arbitrary")),
    )(lens_p, x_tm, wih_t, whh_t, bih, bhh)

    unpacked_outputs = jnp.transpose(out_tm, (1, 0, 2))[:B, :T, :H]   # (B, T, H)
    final_hiddens = hN[:B, :H][None, :, :]                            # (1, B, H)
    encodings = jnp.mean(final_hiddens, axis=0)                       # (B, H)
    return unpacked_outputs, final_hiddens, encodings


# ---------------- pure-JAX reference (for correctness check) ----------------
def _gru_reference(x, w_ih, w_hh, b_ih, b_hh, lens):
    B, T, I = x.shape
    H = w_hh.shape[1]

    def step(h, inp):
        x_t, t = inp
        gi = x_t @ w_ih.T + b_ih
        gh = h @ w_hh.T + b_hh
        r = jax.nn.sigmoid(gi[:, :H] + gh[:, :H])
        z = jax.nn.sigmoid(gi[:, H:2 * H] + gh[:, H:2 * H])
        n = jnp.tanh(gi[:, 2 * H:] + r * gh[:, 2 * H:])
        h_new = (1.0 - z) * n + z * h
        mask = (t < lens)[:, None]
        h_upd = jnp.where(mask, h_new, h)
        out = jnp.where(mask, h_new, 0.0)
        return h_upd, out

    h0 = jnp.zeros((B, H), jnp.float32)
    hN, outs = lax.scan(step, h0,
                        (jnp.transpose(x, (1, 0, 2)), jnp.arange(T)))
    return jnp.transpose(outs, (1, 0, 2)), hN[None], hN


if __name__ == "__main__":
    B, T, I, H = 2, 8, 16, 32   # batch, seq, input_dim, hidden_dim

    key = jax.random.PRNGKey(0)
    kx, k1, k2, k3, k4 = jax.random.split(key, 5)

    # U(-1/sqrt(H), 1/sqrt(H)) (PyTorch GRU default init)
    bound = 1.0 / jnp.sqrt(jnp.float32(H))
    w_ih = jax.random.uniform(k1, (3 * H, I), jnp.float32, -bound, bound)
    w_hh = jax.random.uniform(k2, (3 * H, H), jnp.float32, -bound, bound)
    b_ih = jax.random.uniform(k3, (3 * H,), jnp.float32, -bound, bound)
    b_hh = jax.random.uniform(k4, (3 * H,), jnp.float32, -bound, bound)

    x = jax.random.normal(kx, (B, T, I), jnp.float32)
    lens_full = jnp.full((B,), T, jnp.int32)

    # Case 1: input_lens=None, two streamed time blocks (t_blk=4) -> fast path
    # (no masking) + cross-block hidden-state carry.
    outs, finals, enc = dynamic_gru_pallas(x, w_ih, w_hh, b_ih, b_hh, None, t_blk=4)
    jax.block_until_ready((outs, finals, enc))
    r_outs, r_finals, r_enc = _gru_reference(x, w_ih, w_hh, b_ih, b_hh, lens_full)
    assert outs.shape == (B, T, H) and finals.shape == (1, B, H) and enc.shape == (B, H)
    assert jnp.allclose(outs, r_outs, atol=2e-5)
    assert jnp.allclose(finals, r_finals, atol=2e-5)
    assert jnp.allclose(enc, r_enc, atol=2e-5)

    # Case 2: variable lengths, single time block (t_blk=8) -> masked recurrence.
    lens = jnp.array([T, 5], jnp.int32)
    outs2, finals2, enc2 = dynamic_gru_pallas(x, w_ih, w_hh, b_ih, b_hh, lens, t_blk=8)
    jax.block_until_ready((outs2, finals2, enc2))
    r_outs2, r_finals2, r_enc2 = _gru_reference(x, w_ih, w_hh, b_ih, b_hh, lens)
    assert jnp.allclose(outs2, r_outs2, atol=2e-5)
    assert jnp.allclose(finals2, r_finals2, atol=2e-5)
    assert jnp.allclose(enc2, r_enc2, atol=2e-5)

    # Case 3: variable lengths + multi-block streaming (mask + carry together).
    outs3, finals3, enc3 = dynamic_gru_pallas(x, w_ih, w_hh, b_ih, b_hh, lens, t_blk=4)
    jax.block_until_ready((outs3, finals3, enc3))
    assert jnp.allclose(outs3, r_outs2, atol=2e-5)
    assert jnp.allclose(finals3, r_finals2, atol=2e-5)
    assert jnp.allclose(enc3, r_enc2, atol=2e-5)

    print("KERNEL_OK")
</pallas_src>

<mosaic_0001>
module attributes {stable_mosaic.version = 11 : i64} {
  func.func @_gru_kernel(%arg0: i32, %arg1: i32, %arg2: memref<8x1xi32, #tpu.memory_space<vmem>>, %arg3: memref<4x8x16xf32, #tpu.memory_space<vmem>>, %arg4: memref<16x384xf32, #tpu.memory_space<vmem>>, %arg5: memref<128x384xf32, #tpu.memory_space<vmem>>, %arg6: memref<1x384xf32, #tpu.memory_space<vmem>>, %arg7: memref<1x384xf32, #tpu.memory_space<vmem>>, %arg8: memref<4x8x128xf32, #tpu.memory_space<vmem>>, %arg9: memref<8x128xf32, #tpu.memory_space<vmem>>, %arg10: memref<4x8x384xf32, #tpu.memory_space<vmem>>) attributes {dimension_semantics = [#tpu.dimension_semantics<parallel>, #tpu.dimension_semantics<arbitrary>], iteration_bounds = array<i64: 1, 2>, scalar_prefetch = 0 : i64, scratch_operands = 1 : i64, tpu.core_type = #tpu.core_type<tc>, window_params = [{transform_indices = @transform_0, window_bounds = array<i64: 8, 1>}, {transform_indices = @transform_1, window_bounds = array<i64: 4, 8, 16>}, {pipeline_mode = #tpu.pipeline_mode<synchronous>, transform_indices = @transform_2, window_bounds = array<i64: 16, 384>}, {pipeline_mode = #tpu.pipeline_mode<synchronous>, transform_indices = @transform_3, window_bounds = array<i64: 128, 384>}, {pipeline_mode = #tpu.pipeline_mode<synchronous>, transform_indices = @transform_4, window_bounds = array<i64: 1, 384>}, {pipeline_mode = #tpu.pipeline_mode<synchronous>, transform_indices = @transform_5, window_bounds = array<i64: 1, 384>}, {transform_indices = @transform_6, window_bounds = array<i64: 4, 8, 128>}, {transform_indices = @transform_7, window_bounds = array<i64: 8, 128>}]} {
    %c0_i32 = arith.constant 0 : i32
    %0 = arith.cmpi eq, %arg1, %c0_i32 : i32
    %1 = arith.extui %0 : i1 to i32
    %c0_i32_0 = arith.constant 0 : i32
    %2 = arith.cmpi ne, %1, %c0_i32_0 : i32
    scf.if %2 {
      %cst_51 = arith.constant 0.000000e+00 : f32
      %158 = vector.broadcast %cst_51 : f32 to vector<8x128xf32>
      %c0_52 = arith.constant 0 : index
      %c0_53 = arith.constant 0 : index
      %159 = vector.load %arg9[%c0_52, %c0_53] : memref<8x128xf32, #tpu.memory_space<vmem>>, vector<8x128xf32>
      tpu.vector_store %arg9[%c0_52, %c0_53], %158 {strides = array<i32>} : memref<8x128xf32, #tpu.memory_space<vmem>>, vector<8x128xf32>,
    } else {
    }
    %c0 = arith.constant 0 : index
    %c0_1 = arith.constant 0 : index
    %c0_2 = arith.constant 0 : index
    %3 = vector.load %arg3[%c0, %c0_1, %c0_2] : memref<4x8x16xf32, #tpu.memory_space<vmem>>, vector<4x8x16xf32>
    %4 = vector.shape_cast %3 : vector<4x8x16xf32> to vector<32x16xf32>
    %c0_3 = arith.constant 0 : index
    %c0_4 = arith.constant 0 : index
    %5 = vector.load %arg4[%c0_3, %c0_4] : memref<16x384xf32, #tpu.memory_space<vmem>>, vector<16x384xf32>
    %cst = arith.constant dense<0.000000e+00> : vector<32x384xf32>
    %6 = tpu.matmul %4, %5, %cst {dimension_numbers = #tpu.dot_dimension_numbers<[1], [0], [0], [1], [0, 0, 1, 1], [], []>} : vector<32x16xf32>, vector<16x384xf32>, vector<32x384xf32> -> vector<32x384xf32>
    %c0_5 = arith.constant 0 : index
    %c0_6 = arith.constant 0 : index
    %7 = vector.load %arg6[%c0_5, %c0_6] : memref<1x384xf32, #tpu.memory_space<vmem>>, vector<1x384xf32>
    %8 = vector.broadcast %7 : vector<1x384xf32> to vector<32x384xf32>
    %9 = arith.addf %6, %8 : vector<32x384xf32>
    %10 = vector.shape_cast %9 : vector<32x384xf32> to vector<4x8x384xf32>
    %c0_7 = arith.constant 0 : index
    %c0_8 = arith.constant 0 : index
    %c0_9 = arith.constant 0 : index
    %11 = vector.load %arg10[%c0_7, %c0_8, %c0_9] : memref<4x8x384xf32, #tpu.memory_space<vmem>>, vector<4x8x384xf32>
    tpu.vector_store %arg10[%c0_7, %c0_8, %c0_9], %10 {strides = array<i32>} : memref<4x8x384xf32, #tpu.memory_space<vmem>>, vector<4x8x384xf32>,
    %c0_10 = arith.constant 0 : index
    %c0_11 = arith.constant 0 : index
    %12 = vector.load %arg5[%c0_10, %c0_11] : memref<128x384xf32, #tpu.memory_space<vmem>>, vector<128x384xf32>
    %c0_12 = arith.constant 0 : index
    %c0_13 = arith.constant 0 : index
    %13 = vector.load %arg7[%c0_12, %c0_13] : memref<1x384xf32, #tpu.memory_space<vmem>>, vector<1x384xf32>
    %14 = vector.shape_cast %13 : vector<1x384xf32> to vector<1x384xf32>
    %15 = vector.broadcast %14 : vector<1x384xf32> to vector<8x384xf32>
    %c0_14 = arith.constant 0 : index
    %c0_15 = arith.constant 0 : index
    %16 = vector.load %arg9[%c0_14, %c0_15] : memref<8x128xf32, #tpu.memory_space<vmem>>, vector<8x128xf32>
    %c0_i32_16 = arith.constant 0 : i32
    %17 = arith.index_cast %c0_i32_16 : i32 to index
    %c0_17 = arith.constant 0 : index
    %c0_18 = arith.constant 0 : index
    %18 = vector.load %arg10[%17, %c0_17, %c0_18] : memref<4x8x384xf32, #tpu.memory_space<vmem>>, vector<1x8x384xf32>
    %19 = vector.shape_cast %18 : vector<1x8x384xf32> to vector<8x384xf32>
    %cst_19 = arith.constant dense<0.000000e+00> : vector<8x384xf32>
    %20 = tpu.matmul %16, %12, %cst_19 {dimension_numbers = #tpu.dot_dimension_numbers<[1], [0], [0], [1], [0, 0, 1, 1], [], []>} : vector<8x128xf32>, vector<128x384xf32>, vector<8x384xf32> -> vector<8x384xf32>
    %21 = arith.addf %20, %15 : vector<8x384xf32>
    %22 = vector.extract_strided_slice %19 {offsets = [0, 0], sizes = [8, 128], strides = [1, 1]} : vector<8x384xf32> to vector<8x128xf32>
    %23 = vector.extract_strided_slice %21 {offsets = [0, 0], sizes = [8, 128], strides = [1, 1]} : vector<8x384xf32> to vector<8x128xf32>
    %24 = arith.addf %22, %23 : vector<8x128xf32>
    %25 = arith.negf %24 : vector<8x128xf32>
    %26 = math.exp %25 : vector<8x128xf32>
    %cst_20 = arith.constant 1.000000e+00 : f32
    %27 = vector.broadcast %cst_20 : f32 to vector<8x128xf32>
    %28 = arith.addf %27, %26 : vector<8x128xf32>
    %29 = arith.divf %27, %28 : vector<8x128xf32>
    %30 = vector.extract_strided_slice %19 {offsets = [0, 128], sizes = [8, 128], strides = [1, 1]} : vector<8x384xf32> to vector<8x128xf32>
    %31 = vector.extract_strided_slice %21 {offsets = [0, 128], sizes = [8, 128], strides = [1, 1]} : vector<8x384xf32> to vector<8x128xf32>
    %32 = arith.addf %30, %31 : vector<8x128xf32>
    %33 = arith.negf %32 : vector<8x128xf32>
    %34 = math.exp %33 : vector<8x128xf32>
    %cst_21 = arith.constant 1.000000e+00 : f32
    %35 = vector.broadcast %cst_21 : f32 to vector<8x128xf32>
    %36 = arith.addf %35, %34 : vector<8x128xf32>
    %37 = arith.divf %35, %36 : vector<8x128xf32>
    %38 = vector.extract_strided_slice %19 {offsets = [0, 256], sizes = [8, 128], strides = [1, 1]} : vector<8x384xf32> to vector<8x128xf32>
    %39 = vector.extract_strided_slice %21 {offsets = [0, 256], sizes = [8, 128], strides = [1, 1]} : vector<8x384xf32> to vector<8x128xf32>
    %40 = arith.mulf %29, %39 : vector<8x128xf32>
    %41 = arith.addf %38, %40 : vector<8x128xf32>
    %42 = math.tanh %41 : vector<8x128xf32>
    %cst_22 = arith.constant 1.000000e+00 : f32
    %43 = vector.broadcast %cst_22 : f32 to vector<8x128xf32>
    %44 = arith.subf %43, %37 : vector<8x128xf32>
    %45 = arith.mulf %44, %42 : vector<8x128xf32>
    %46 = arith.mulf %37, %16 : vector<8x128xf32>
    %47 = arith.addf %45, %46 : vector<8x128xf32>
    %48 = arith.index_cast %c0_i32_16 : i32 to index
    %c0_23 = arith.constant 0 : index
    %c0_24 = arith.constant 0 : index
    %49 = vector.load %arg8[%48, %c0_23, %c0_24] : memref<4x8x128xf32, #tpu.memory_space<vmem>>, vector<1x8x128xf32>
    %50 = vector.shape_cast %49 : vector<1x8x128xf32> to vector<8x128xf32>
    %51 = vector.shape_cast %47 : vector<8x128xf32> to vector<1x8x128xf32>
    tpu.vector_store %arg8[%48, %c0_23, %c0_24], %51 {strides = array<i32>} : memref<4x8x128xf32, #tpu.memory_space<vmem>>, vector<1x8x128xf32>,
    %c1_i32 = arith.constant 1 : i32
    %52 = arith.index_cast %c1_i32 : i32 to index
    %c0_25 = arith.constant 0 : index
    %c0_26 = arith.constant 0 : index
    %53 = vector.load %arg10[%52, %c0_25, %c0_26] : memref<4x8x384xf32, #tpu.memory_space<vmem>>, vector<1x8x384xf32>
    %54 = vector.shape_cast %53 : vector<1x8x384xf32> to vector<8x384xf32>
    %cst_27 = arith.constant dense<0.000000e+00> : vector<8x384xf32>
    %55 = tpu.matmul %47, %12, %cst_27 {dimension_numbers = #tpu.dot_dimension_numbers<[1], [0], [0], [1], [0, 0, 1, 1], [], []>} : vector<8x128xf32>, vector<128x384xf32>, vector<8x384xf32> -> vector<8x384xf32>
    %56 = arith.addf %55, %15 : vector<8x384xf32>
    %57 = vector.extract_strided_slice %54 {offsets = [0, 0], sizes = [8, 128], strides = [1, 1]} : vector<8x384xf32> to vector<8x128xf32>
    %58 = vector.extract_strided_slice %56 {offsets = [0, 0], sizes = [8, 128], strides = [1, 1]} : vector<8x384xf32> to vector<8x128xf32>
    %59 = arith.addf %57, %58 : vector<8x128xf32>
    %60 = arith.negf %59 : vector<8x128xf32>
    %61 = math.exp %60 : vector<8x128xf32>
    %cst_28 = arith.constant 1.000000e+00 : f32
    %62 = vector.broadcast %cst_28 : f32 to vector<8x128xf32>
    %63 = arith.addf %62, %61 : vector<8x128xf32>
    %64 = arith.divf %62, %63 : vector<8x128xf32>
    %65 = vector.extract_strided_slice %54 {offsets = [0, 128], sizes = [8, 128], strides = [1, 1]} : vector<8x384xf32> to vector<8x128xf32>
    %66 = vector.extract_strided_slice %56 {offsets = [0, 128], sizes = [8, 128], strides = [1, 1]} : vector<8x384xf32> to vector<8x128xf32>
    %67 = arith.addf %65, %66 : vector<8x128xf32>
    %68 = arith.negf %67 : vector<8x128xf32>
    %69 = math.exp %68 : vector<8x128xf32>
    %cst_29 = arith.constant 1.000000e+00 : f32
    %70 = vector.broadcast %cst_29 : f32 to vector<8x128xf32>
    %71 = arith.addf %70, %69 : vector<8x128xf32>
    %72 = arith.divf %70, %71 : vector<8x128xf32>
    %73 = vector.extract_strided_slice %54 {offsets = [0, 256], sizes = [8, 128], strides = [1, 1]} : vector<8x384xf32> to vector<8x128xf32>
    %74 = vector.extract_strided_slice %56 {offsets = [0, 256], sizes = [8, 128], strides = [1, 1]} : vector<8x384xf32> to vector<8x128xf32>
    %75 = arith.mulf %64, %74 : vector<8x128xf32>
    %76 = arith.addf %73, %75 : vector<8x128xf32>
    %77 = math.tanh %76 : vector<8x128xf32>
    %cst_30 = arith.constant 1.000000e+00 : f32
    %78 = vector.broadcast %cst_30 : f32 to vector<8x128xf32>
    %79 = arith.subf %78, %72 : vector<8x128xf32>
    %80 = arith.mulf %79, %77 : vector<8x128xf32>
    %81 = arith.mulf %72, %47 : vector<8x128xf32>
    %82 = arith.addf %80, %81 : vector<8x128xf32>
    %83 = arith.index_cast %c1_i32 : i32 to index
    %c0_31 = arith.constant 0 : index
    %c0_32 = arith.constant 0 : index
    %84 = vector.load %arg8[%83, %c0_31, %c0_32] : memref<4x8x128xf32, #tpu.memory_space<vmem>>, vector<1x8x128xf32>
    %85 = vector.shape_cast %84 : vector<1x8x128xf32> to vector<8x128xf32>
    %86 = vector.shape_cast %82 : vector<8x128xf32> to vector<1x8x128xf32>
    tpu.vector_store %arg8[%83, %c0_31, %c0_32], %86 {strides = array<i32>} : memref<4x8x128xf32, #tpu.memory_space<vmem>>, vector<1x8x128xf32>,
    %c2_i32 = arith.constant 2 : i32
    %87 = arith.index_cast %c2_i32 : i32 to index
    %c0_33 = arith.constant 0 : index
    %c0_34 = arith.constant 0 : index
    %88 = vector.load %arg10[%87, %c0_33, %c0_34] : memref<4x8x384xf32, #tpu.memory_space<vmem>>, vector<1x8x384xf32>
    %89 = vector.shape_cast %88 : vector<1x8x384xf32> to vector<8x384xf32>
    %cst_35 = arith.constant dense<0.000000e+00> : vector<8x384xf32>
    %90 = tpu.matmul %82, %12, %cst_35 {dimension_numbers = #tpu.dot_dimension_numbers<[1], [0], [0], [1], [0, 0, 1, 1], [], []>} : vector<8x128xf32>, vector<128x384xf32>, vector<8x384xf32> -> vector<8x384xf32>
    %91 = arith.addf %90, %15 : vector<8x384xf32>
    %92 = vector.extract_strided_slice %89 {offsets = [0, 0], sizes = [8, 128], strides = [1, 1]} : vector<8x384xf32> to vector<8x128xf32>
    %93 = vector.extract_strided_slice %91 {offsets = [0, 0], sizes = [8, 128], strides = [1, 1]} : vector<8x384xf32> to vector<8x128xf32>
    %94 = arith.addf %92, %93 : vector<8x128xf32>
    %95 = arith.negf %94 : vector<8x128xf32>
    %96 = math.exp %95 : vector<8x128xf32>
    %cst_36 = arith.constant 1.000000e+00 : f32
    %97 = vector.broadcast %cst_36 : f32 to vector<8x128xf32>
    %98 = arith.addf %97, %96 : vector<8x128xf32>
    %99 = arith.divf %97, %98 : vector<8x128xf32>
    %100 = vector.extract_strided_slice %89 {offsets = [0, 128], sizes = [8, 128], strides = [1, 1]} : vector<8x384xf32> to vector<8x128xf32>
    %101 = vector.extract_strided_slice %91 {offsets = [0, 128], sizes = [8, 128], strides = [1, 1]} : vector<8x384xf32> to vector<8x128xf32>
    %102 = arith.addf %100, %101 : vector<8x128xf32>
    %103 = arith.negf %102 : vector<8x128xf32>
    %104 = math.exp %103 : vector<8x128xf32>
    %cst_37 = arith.constant 1.000000e+00 : f32
    %105 = vector.broadcast %cst_37 : f32 to vector<8x128xf32>
    %106 = arith.addf %105, %104 : vector<8x128xf32>
    %107 = arith.divf %105, %106 : vector<8x128xf32>
    %108 = vector.extract_strided_slice %89 {offsets = [0, 256], sizes = [8, 128], strides = [1, 1]} : vector<8x384xf32> to vector<8x128xf32>
    %109 = vector.extract_strided_slice %91 {offsets = [0, 256], sizes = [8, 128], strides = [1, 1]} : vector<8x384xf32> to vector<8x128xf32>
    %110 = arith.mulf %99, %109 : vector<8x128xf32>
    %111 = arith.addf %108, %110 : vector<8x128xf32>
    %112 = math.tanh %111 : vector<8x128xf32>
    %cst_38 = arith.constant 1.000000e+00 : f32
    %113 = vector.broadcast %cst_38 : f32 to vector<8x128xf32>
    %114 = arith.subf %113, %107 : vector<8x128xf32>
    %115 = arith.mulf %114, %112 : vector<8x128xf32>
    %116 = arith.mulf %107, %82 : vector<8x128xf32>
    %117 = arith.addf %115, %116 : vector<8x128xf32>
    %118 = arith.index_cast %c2_i32 : i32 to index
    %c0_39 = arith.constant 0 : index
    %c0_40 = arith.constant 0 : index
    %119 = vector.load %arg8[%118, %c0_39, %c0_40] : memref<4x8x128xf32, #tpu.memory_space<vmem>>, vector<1x8x128xf32>
    %120 = vector.shape_cast %119 : vector<1x8x128xf32> to vector<8x128xf32>
    %121 = vector.shape_cast %117 : vector<8x128xf32> to vector<1x8x128xf32>
    tpu.vector_store %arg8[%118, %c0_39, %c0_40], %121 {strides = array<i32>} : memref<4x8x128xf32, #tpu.memory_space<vmem>>, vector<1x8x128xf32>,
    %c3_i32 = arith.constant 3 : i32
    %122 = arith.index_cast %c3_i32 : i32 to index
    %c0_41 = arith.constant 0 : index
    %c0_42 = arith.constant 0 : index
    %123 = vector.load %arg10[%122, %c0_41, %c0_42] : memref<4x8x384xf32, #tpu.memory_space<vmem>>, vector<1x8x384xf32>
    %124 = vector.shape_cast %123 : vector<1x8x384xf32> to vector<8x384xf32>
    %cst_43 = arith.constant dense<0.000000e+00> : vector<8x384xf32>
    %125 = tpu.matmul %117, %12, %cst_43 {dimension_numbers = #tpu.dot_dimension_numbers<[1], [0], [0], [1], [0, 0, 1, 1], [], []>} : vector<8x128xf32>, vector<128x384xf32>, vector<8x384xf32> -> vector<8x384xf32>
    %126 = arith.addf %125, %15 : vector<8x384xf32>
    %127 = vector.extract_strided_slice %124 {offsets = [0, 0], sizes = [8, 128], strides = [1, 1]} : vector<8x384xf32> to vector<8x128xf32>
    %128 = vector.extract_strided_slice %126 {offsets = [0, 0], sizes = [8, 128], strides = [1, 1]} : vector<8x384xf32> to vector<8x128xf32>
    %129 = arith.addf %127, %128 : vector<8x128xf32>
    %130 = arith.negf %129 : vector<8x128xf32>
    %131 = math.exp %130 : vector<8x128xf32>
    %cst_44 = arith.constant 1.000000e+00 : f32
    %132 = vector.broadcast %cst_44 : f32 to vector<8x128xf32>
    %133 = arith.addf %132, %131 : vector<8x128xf32>
    %134 = arith.divf %132, %133 : vector<8x128xf32>
    %135 = vector.extract_strided_slice %124 {offsets = [0, 128], sizes = [8, 128], strides = [1, 1]} : vector<8x384xf32> to vector<8x128xf32>
    %136 = vector.extract_strided_slice %126 {offsets = [0, 128], sizes = [8, 128], strides = [1, 1]} : vector<8x384xf32> to vector<8x128xf32>
    %137 = arith.addf %135, %136 : vector<8x128xf32>
    %138 = arith.negf %137 : vector<8x128xf32>
    %139 = math.exp %138 : vector<8x128xf32>
    %cst_45 = arith.constant 1.000000e+00 : f32
    %140 = vector.broadcast %cst_45 : f32 to vector<8x128xf32>
    %141 = arith.addf %140, %139 : vector<8x128xf32>
    %142 = arith.divf %140, %141 : vector<8x128xf32>
    %143 = vector.extract_strided_slice %124 {offsets = [0, 256], sizes = [8, 128], strides = [1, 1]} : vector<8x384xf32> to vector<8x128xf32>
    %144 = vector.extract_strided_slice %126 {offsets = [0, 256], sizes = [8, 128], strides = [1, 1]} : vector<8x384xf32> to vector<8x128xf32>
    %145 = arith.mulf %134, %144 : vector<8x128xf32>
    %146 = arith.addf %143, %145 : vector<8x128xf32>
    %147 = math.tanh %146 : vector<8x128xf32>
    %cst_46 = arith.constant 1.000000e+00 : f32
    %148 = vector.broadcast %cst_46 : f32 to vector<8x128xf32>
    %149 = arith.subf %148, %142 : vector<8x128xf32>
    %150 = arith.mulf %149, %147 : vector<8x128xf32>
    %151 = arith.mulf %142, %117 : vector<8x128xf32>
    %152 = arith.addf %150, %151 : vector<8x128xf32>
    %153 = arith.index_cast %c3_i32 : i32 to index
    %c0_47 = arith.constant 0 : index
    %c0_48 = arith.constant 0 : index
    %154 = vector.load %arg8[%153, %c0_47, %c0_48] : memref<4x8x128xf32, #tpu.memory_space<vmem>>, vector<1x8x128xf32>
    %155 = vector.shape_cast %154 : vector<1x8x128xf32> to vector<8x128xf32>
    %156 = vector.shape_cast %152 : vector<8x128xf32> to vector<1x8x128xf32>
    tpu.vector_store %arg8[%153, %c0_47, %c0_48], %156 {strides = array<i32>} : memref<4x8x128xf32, #tpu.memory_space<vmem>>, vector<1x8x128xf32>,
    %c4_i32 = arith.constant 4 : i32
    %c0_49 = arith.constant 0 : index
    %c0_50 = arith.constant 0 : index
    %157 = vector.load %arg9[%c0_49, %c0_50] : memref<8x128xf32, #tpu.memory_space<vmem>>, vector<8x128xf32>
    tpu.vector_store %arg9[%c0_49, %c0_50], %152 {strides = array<i32>} : memref<8x128xf32, #tpu.memory_space<vmem>>, vector<8x128xf32>,
    return
  }
  func.func @transform_0(%arg0: i32, %arg1: i32) -> (i32, i32) {
    %c0_i32 = arith.constant 0 : i32
    %c0_i32_0 = arith.constant 0 : i32
    return %arg0, %c0_i32 : i32, i32
  }
  func.func @transform_1(%arg0: i32, %arg1: i32) -> (i32, i32, i32) {
    %c0_i32 = arith.constant 0 : i32
    %c0_i32_0 = arith.constant 0 : i32
    return %arg1, %arg0, %c0_i32 : i32, i32, i32
  }
  func.func @transform_2(%arg0: i32, %arg1: i32) -> (i32, i32) {
    %c0_i32 = arith.constant 0 : i32
    %c0_i32_0 = arith.constant 0 : i32
    %c0_i32_1 = arith.constant 0 : i32
    return %c0_i32, %c0_i32_0 : i32, i32
  }
  func.func @transform_3(%arg0: i32, %arg1: i32) -> (i32, i32) {
    %c0_i32 = arith.constant 0 : i32
    %c0_i32_0 = arith.constant 0 : i32
    %c0_i32_1 = arith.constant 0 : i32
    return %c0_i32, %c0_i32_0 : i32, i32
  }
  func.func @transform_4(%arg0: i32, %arg1: i32) -> (i32, i32) {
    %c0_i32 = arith.constant 0 : i32
    %c0_i32_0 = arith.constant 0 : i32
    %c0_i32_1 = arith.constant 0 : i32
    return %c0_i32, %c0_i32_0 : i32, i32
  }
  func.func @transform_5(%arg0: i32, %arg1: i32) -> (i32, i32) {
    %c0_i32 = arith.constant 0 : i32
    %c0_i32_0 = arith.constant 0 : i32
    %c0_i32_1 = arith.constant 0 : i32
    return %c0_i32, %c0_i32_0 : i32, i32
  }
  func.func @transform_6(%arg0: i32, %arg1: i32) -> (i32, i32, i32) {
    %c0_i32 = arith.constant 0 : i32
    %c0_i32_0 = arith.constant 0 : i32
    return %arg1, %arg0, %c0_i32 : i32, i32, i32
  }
  func.func @transform_7(%arg0: i32, %arg1: i32) -> (i32, i32) {
    %c0_i32 = arith.constant 0 : i32
    %c0_i32_0 = arith.constant 0 : i32
    return %arg0, %c0_i32 : i32, i32
  }
}

</mosaic_0001>

<bundles_post_ra>
// kernel: tpu_custom_call.1
= control target key start
LH: loop header
LB: loop body
LE: loop exit
PB: predicated region body
PF: predicated region fallthrough
CT: control target
= control target key end

     0   :  { %13 = vsyncpa [#allocation4], 0  ;;  %s2959_s0 = inlined_call_operand.vmem [shape: s32[8,1], index: 0, kind: input, shape index: {}]   ;;  %s2960_s1 = inlined_call_operand.hbm [shape: f32[8,8,16], index: 1, kind: input, shape index: {}]   ;;  %s2961_s2 = inlined_call_operand.hbm [shape: f32[16,384], index: 2, kind: input, shape index: {}]   ;;  %s2962_s3 = inlined_call_operand.hbm [shape: f32[128,384], index: 3, kind: input, shape index: {}]   ;;  %s2963_s4 = inlined_call_operand.vmem [shape: f32[1,384], index: 4, kind: input, shape index: {}]   ;;  %s2964_s5 = inlined_call_operand.vmem [shape: f32[1,384], index: 5, kind: input, shape index: {}]   ;;  %s2965_s6 = inlined_call_operand.hbm [shape: f32[8,8,128], index: 6, kind: output, shape index: {0}]   ;;  %s2966_s7 = inlined_call_operand.hbm [shape: f32[8,128], index: 7, kind: output, shape index: {1}]  }
   0x1   :  { %15 = vsyncpa [#allocation4 + $0x1], 0 }
   0x2   :  { %16 = vsyncpa [#allocation7], 0 }
   0x3   :  { %17 = vsyncpa [#allocation5], 0 }
   0x4   :  { %19 = vsyncpa [#allocation5 + $0x1], 0 }
   0x5   :  { %20 = vsyncpa [#allocation11], 0  ;;  %s2417_s23 = smov 0   ;;  %s2419_s24 = smov 0  }
   0x6   :  { %s2421_s25 = smov 0   ;;  %s2423_s26 = smov 0  }
   0x7   :  { %s2425_s27 = smov 0   ;;  %s2427_s28 = smov 0  }
   0x8 LB: > { %s1494_s29 = sadd.s32 4294967295, %s2360_s28   ;;  %s1495_s30 = sadd.s32 4294967294, %s2360_s28   ;;  %s2360_s28 = sphi %s2427_s28, %s26_s28   ;;  %s2356_s27 = sphi %s2425_s27, %s2994_s27   ;;  %s2352_s26 = sphi %s2423_s26, %s2993_s26   ;;  %s2348_s25 = sphi %s2421_s25, %s2992_s25   ;;  %s2344_s24 = sphi %s2419_s24, %s2991_s24   ;;  %s2340_s23 = sphi %s2417_s23, %s2990_s23  }
   0x9   : > { %p86_p0 = scmp.ne.s32.totalorder %s2344_s24, %s2340_s23  ;;  %p2451_p1 = scmp.eq.s32.totalorder %s1494_s29, 0 }
   0xa   : > { %p2455_p2 = scmp.eq.s32.totalorder %s1494_s29, 1  ;;  %p202_p3 = scmp.eq.s32.totalorder %s1495_s30, 1 }
   0xb   : > { %s2974_s8 = scalar_select %p2451_p1, 1, 0 }
   0xc   : > { %s2975_s9 = scalar_select %p2455_p2, 1, 0 }
   0xd   : > { %p2461_p4 = por %p2451_p1, %p86_p0  ;;  %p1496_p5 = scmp.ge.s32.totalorder %s2360_s28, 1 }
   0xe   : > { %p2466_p6 = por %p202_p3, %p86_p0  ;;  %p235_p7 = scmp.lt.s32.totalorder %s2360_s28, 3 }
   0xf   : > { %s2976_s10 = scalar_select %p2461_p4, 1, 0 }
  0x10   : > { %s2977_s11 = scalar_select %p2466_p6, 1, 0 }
  0x11   : > { %p2471_p8 = pnand %p1496_p5, %p235_p7  ;;  %s2362_s13 = smov [#allocation6]  }
  0x12   : > { %2978 = sst [smem:[#allocation16_spill]] %s2977_s11  ;;  %s254_s14 = sshll.u32 %s2362_s13, 4  ;;  %s2475_s14 = int_to_ptr.vmem [resolvable:$true] %s254_s14 }
  0x13   : > { %p2034_p9 = pneg %p2471_p8  ;;  %s2363_s16 = smov [#allocation8]  }
  0x14   : > { %s267_s17 = sshll.u32 %s2363_s16, 4  ;;  %s2158_s20 = scalar_lea.hbm %s2961_s2, 768  ;;  %s2486_s17 = int_to_ptr.vmem [resolvable:$true] %s267_s17 }
  0x15   : > { %p2482_p11 = pnand %p2034_p9, %p2451_p1  ;;  %p2159_p12 = scmp.ne.s32.totalorder %s2961_s2, %s2158_s20 }
  0x16   : > { %p2165_p5 = scmp.lt.u32.totalorder %s2158_s20, %s2961_s2 }
  0x17   : > { %p2160_p13 = pneg %p2482_p11 }
  0x19   : > { %p2161_p0 = pnand %p2160_p13, %p2159_p12 }
  0x1b   : > { %p2162_p3 = pneg %p2161_p0 }
  0x1d   : > { %p2167_p7 = pnand %p2165_p5, %p2162_p3 }
  0x1f   : > { %2170 = shalt.err (!%p2167_p7)
}
  0x20   : > { %s2171_s30 = scalar_lea.vmem %s2475_s14, 768  ;;  %p2179_p1 = scmp.lt.s32.totalorder %s2475_s14, %s2475_s14 }
  0x21   : > { %p2172_p9 = scmp.ne.s32.totalorder %s2475_s14, %s2171_s30  ;;  %p2180_p12 = scmp.lt.s32.totalorder %s2171_s30, %s2171_s30 }
  0x23   : > { %p2174_p10 = pnand %p2172_p9, %p2160_p13  ;;  %p2181_p0 = por %p2180_p12, %p2179_p1 }
  0x25   : > { %p2175_p6 = pneg %p2174_p10 }
  0x27   : > { %p2182_p4 = pnand %p2181_p0, %p2175_p6 }
  0x29   : > { %2185 = shalt.err (!%p2182_p4)
}
  0x2a   : > { %s2364_s13 = smov 384   ;;  %s2365_s16 = smov 24  }
  0x2b   : > { %2037 = dma.hbm_to_vmem [thread:$0]  (!%p2482_p11), %s2961_s2, 768, %s2475_s14, [#allocation7], %s2364_s13, %s2364_s13, %s2365_s16  }
  0x2c   : > { %s2186_s22 = scalar_lea.hbm %s2962_s3, 6144 }
  0x2d   : > { %p2187_p1 = scmp.ne.s32.totalorder %s2962_s3, %s2186_s22  ;;  %p2193_p10 = scmp.lt.u32.totalorder %s2186_s22, %s2962_s3 }
  0x2f   : > { %p2189_p4 = pnand %p2187_p1, %p2160_p13 }
  0x31   : > { %p2190_p6 = pneg %p2189_p4 }
  0x33   : > { %p2195_p3 = pnand %p2193_p10, %p2190_p6 }
  0x35   : > { %2198 = shalt.err (!%p2195_p3)
}
  0x36   : > { %s2199_s14 = scalar_lea.vmem %s2486_s17, 6144  ;;  %p2207_p12 = scmp.lt.s32.totalorder %s2486_s17, %s2486_s17 }
  0x37   : > { %p2200_p5 = scmp.ne.s32.totalorder %s2486_s17, %s2199_s14  ;;  %p2208_p0 = scmp.lt.s32.totalorder %s2199_s14, %s2199_s14 }
  0x39   : > { %p2202_p7 = pnand %p2200_p5, %p2160_p13  ;;  %p2209_p1 = por %p2208_p0, %p2207_p12 }
  0x3b   : > { %p2203_p9 = pneg %p2202_p7 }
  0x3d   : > { %p2210_p4 = pnand %p2209_p1, %p2203_p9 }
  0x3f   : > { %2213 = shalt.err (!%p2210_p4)
}
  0x40   : > { %2040 = dma.hbm_to_vmem [thread:$0]  (!%p2482_p11), %s2962_s3, 6144, %s2486_s17, [#allocation7], %s2364_s13, %s2364_s13, %s2365_s16  }
  0x41   : > { %s35_s19 = sadd.s32 1, %s2356_s27  ;;  %s73_s20 = sadd.s32 1, %s2348_s25 }
  0x42   : > { %p36_p13 = scmp.ge.s32.totalorder %s35_s19, 2  ;;  %p80_p6 = scmp.ne.s32.totalorder %s2348_s25, %s2344_s24 }
  0x43   : > { %p81_p10 = scmp.eq.s32.totalorder %s2360_s28, 0  ;;  %p2051_p3 = scmp.lt.s32.totalorder %s2360_s28, 2 }
  0x44   : > { %s2996_s19 = smov (%p36_p13, %s35_s19), 0  ;;  %p2550_p7 = por %p2455_p2, %p80_p6 }
  0x45   : > { %p82_p5 = por %p81_p10, %p80_p6  ;;  %s68_s21 = ssub.s32 %s2356_s27, %s2996_s19 }
  0x46   : > { %s2981_s15 = scalar_select %p2550_p7, 1, 0 }
  0x47   : > { %s287_s22 = sand.u32 1, %s2348_s25   ;;  %p71_p9 = scmp.eq.s32.totalorder %s68_s21, 0 }
  0x48   : > { %s1501_s17 = sshll.u32 %s287_s22, 5  ;;  %s1536_s13 = sshll.u32 %s2356_s27, 9 }
  0x49   : > { %s2559_s16 = scalar_select %p71_p9, %s2348_s25, %s73_s20  }
  0x4a   : > { %s2564_s30 = scalar_lea.hbm %s2960_s1, %s1536_s13  ;;  %s291_s14 = scalar_lea.vmem [#allocation3], %s1501_s17 }
  0x4b   : > { %s299_s11 = sshll.u32 %s291_s14, 4  ;;  %p2568_p11 = pnand %p2051_p3, %p82_p5  ;;  %s2572_s11 = int_to_ptr.vmem [resolvable:$true] %s299_s11 }
  0x4c   : > { %s2574_s20 = scalar_lea.sflag [#allocation4], %s287_s22  ;;  %s2214_s21 = scalar_lea.hbm %s2564_s30, 512 }
  0x4d   : > { %p2215_p12 = scmp.ne.s32.totalorder %s2564_s30, %s2214_s21  ;;  %p2216_p0 = pneg %p2568_p11 }
  0x4e   : > { %s2219_s0 = scalar_lea.hbm %s2960_s1, 1024  ;;  %p2220_p13 = scmp.lt.u32.totalorder %s2564_s30, %s2960_s1 }
  0x4f   : > { %p2217_p1 = pnand %p2216_p0, %p2215_p12  ;;  %p2221_p6 = scmp.lt.u32.totalorder %s2219_s0, %s2214_s21 }
  0x50   : > { %p2223_p3 = scmp.lt.u32.totalorder %s2214_s21, %s2564_s30 }
  0x51   : > { %p2218_p4 = pneg %p2217_p1  ;;  %p2222_p10 = por %p2221_p6, %p2220_p13 }
  0x53   : > { %p2224_p5 = por %p2223_p3, %p2222_p10 }
  0x55   : > { %p2225_p9 = pnand %p2224_p5, %p2218_p4 }
  0x57   : > { %2228 = shalt.err (!%p2225_p9)
}
  0x58   : > { %s2229_s22 = scalar_lea.vmem %s2572_s11, 512  ;;  %s2366_s17 = smov [#allocation3]  }
  0x59   : > { %p2230_p12 = scmp.ne.s32.totalorder %s2572_s11, %s2229_s22  ;;  %s2234_s13 = sshll.u32 %s2366_s17, 4  ;;  %s2235_s13 = int_to_ptr.vmem [resolvable:$false] %s2234_s13 }
  0x5a   : > { %s2236_s29 = scalar_lea.vmem %s2235_s13, 1024  ;;  %p2237_p7 = scmp.lt.s32.totalorder %s2572_s11, %s2235_s13 }
  0x5b   : > { %p2232_p1 = pnand %p2230_p12, %p2216_p0  ;;  %p2238_p13 = scmp.lt.s32.totalorder %s2236_s29, %s2229_s22 }
  0x5d   : > { %p2233_p2 = pneg %p2232_p1  ;;  %p2239_p6 = por %p2238_p13, %p2237_p7 }
  0x5f   : > { %p2240_p10 = pnand %p2239_p6, %p2233_p2 }
  0x61   : > { %2243 = shalt.err (!%p2240_p10)
}
  0x62   : > { %s2367_s21 = smov 128   ;;  %s2368_s0 = smov 8  }
  0x63   : > { %2044 = dma.hbm_to_vmem [thread:$0]  (!%p2568_p11), %s2564_s30, 512, %s2572_s11, %s2574_s20, %s2367_s21, %s2367_s21, %s2368_s0  }
  0x64   : > { %311 = sbr.rel (%p2471_p8) target bundleno = 1233 (0x4d1), region = 44  ;;  %s2605_s14 = sand.u32 (!%p2471_p8), 1, %s2344_s24  }
  0x65   : > { %s1505_s22 = sshll.u32 (!%p2471_p8), %s2605_s14, 5  ;;  %s314_s17 = scalar_lea.sflag (!%p2471_p8), [#allocation4], %s2605_s14 }
  0x66   : > { %s2609_s13 = scalar_lea.vmem (!%p2471_p8), [#allocation3], %s1505_s22  ;;  %p2983_p2 = scmp.ne.s32.totalorder (!%p2471_p8), %s2976_s10, 0 }
  0x6b   : > { %2323 = dma.done.wait (%p2983_p2), %s314_s17, 512  }
  0x6c   : > { %2325 = vsyncadd (%p2983_p2), %s314_s17, 4294966784  ;;  %p2984_p7 = scmp.ne.s32.totalorder %s2974_s8, 0 }
  0x6e   : > { %2327 = dma.done.wait (%p2984_p7), [#allocation7], 6912  }
  0x6f   : > { %2329 = vsyncadd (%p2984_p7), [#allocation7], 4294960384  ;;  %s2619_s12 = scalar_lea.vmem [#allocation9], %s1505_s22  ;;  %p1509_p8 = scmp.ne.s32.totalorder %s2352_s26, 0 }
  0x70   : > { %v2369_v0 = vmov (!%p1509_p8), 0.0  }
  0x71   : > { %369 = sbr.rel (%p1509_p8) target bundleno = 120 (0x78), region = 60  ;;  %370 = vst [vmem:[#allocation10] sm:$0xff] (!%p1509_p8), %v2369_v0 }
  0x78 PF: > { %v376_v1 = vld [vmem:[#allocation6 + $0x8] sm:$0xff]  ;;  %v379_v2 = vld [vmem:[#allocation6 + $0x20] sm:$0xff]  ;;  %v378_v5 = vld [vmem:[#allocation6 + $0x18] sm:$0xff]  ;;  %v2370_v6 = vmov 0.0   ;;  %vm398_vm0 = vcmask 130048   ;;  %v2371_v42 = vmov 0.0|0.0  }
  0x79   : > { %v375_v3 = vld [vmem:[#allocation6] sm:$0xff]  ;;  %v1762_v4 = vpack.c.bf16 %v379_v2, %v376_v1  ;;  %475 = vmatprep.mubr.f32.mxu0 %v2370_v6  ;;  %v598_v7 = vld [vmem:[#allocation8 + $0x8] sm:$0xff]  ;;  %v601_v8 = vld [vmem:[#allocation8 + $0x20] sm:$0xff]  ;;  %vm2372_vm1 = vmmov 0   ;;  %s1537_s18 = sshll.u32 %s2352_s26, 9  ;;  %s1349_s20 = sshll.u32 %s2619_s12, 4  ;;  %s2880_s20 = int_to_ptr.vmem [resolvable:$true] %s1349_s20 }
  0x7a   : > { %v1764_v9 = vpack.c.bf16 %v378_v5, %v375_v3  ;;  %v2623_v10 = vpack.c.bf16 %v601_v8, %v598_v7  ;;  %v371_v11 = vld [vmem:[%s2609_s13] sm:$0xff]  ;;  %v597_v12 = vld [vmem:[#allocation8] sm:$0xff]  ;;  %v600_v13 = vld [vmem:[#allocation8 + $0x18] sm:$0xff]  ;;  %s2373_s29 = smov [#allocation10]   ;;  %s2878_s17 = scalar_lea.hbm %s2965_s6, %s1537_s18 }
  0x7b   : > { %1763 = vmatprep.subr.bf16.mxu0 %v1762_v4  ;;  %v604_v14 = vld [vmem:[#allocation8 + $0x38] sm:$0xff]  ;;  %v607_v15 = vld [vmem:[#allocation8 + $0x50] sm:$0xff]  ;;  %1616 = vmatprep.mubr.msk.f32.mxu1 %vm398_vm0, %v371_v11  ;;  %v2627_v16 = vpack.c.bf16 %v600_v13, %v597_v12  ;;  %v606_v19 = vld [vmem:[#allocation8 + $0x48] sm:$0xff]  ;;  %s1365_s21 = sshll.u32 %s2373_s29, 4  ;;  %s1335_s26 = scalar_lea.sflag [#allocation5], %s2605_s14  ;;  %s2882_s21 = int_to_ptr.vmem [resolvable:$true] %s1365_s21 }
  0x7c   : > { %1765 = vmatpush1.bf16.msra.mxu0 %v1764_v9  ;;  %v2630_v17 = vpack.c.bf16 %v607_v15, %v604_v14  ;;  %v603_v18 = vld [vmem:[#allocation8 + $0x30] sm:$0xff]  ;;  %v610_v20 = vld [vmem:[#allocation8 + $0x68] sm:$0xff]  ;;  %v613_v21 = vld [vmem:[#allocation8 + $0x80] sm:$0xff]  ;;  %p2985_p0 = scmp.ne.s32.totalorder %s2981_s15, 0  ;;  %s2374_s8 = smov [#allocation9]  }
  0x7d   : > { %1771 = vmatprep.subr.bf16.mxu0 %v2623_v10  ;;  %v2634_v22 = vpack.c.bf16 %v606_v19, %v603_v18  ;;  %v609_v23 = vld [vmem:[#allocation8 + $0x60] sm:$0xff]  ;;  %v372_v24 = vld [vmem:[%s2609_s13 + $0x8] sm:$0xff]  ;;  %v2639_v25 = vpack.c.bf16 %v613_v21, %v610_v20  ;;  %v619_v30 = vld [vmem:[#allocation8 + $0xb0] sm:$0xff]  ;;  %s2248_s10 = sshll.u32 %s2374_s8, 4  ;;  %s2249_s10 = int_to_ptr.vmem [resolvable:$false] %s2248_s10 }
  0x7e   : > { %v612_v26 = vld [vmem:[#allocation8 + $0x78] sm:$0xff]  ;;  %v377_v27 = vld [vmem:[#allocation6 + $0x10] sm:$0xff]  ;;  %v599_v34 = vld [vmem:[#allocation8 + $0x10] sm:$0xff]  ;;  %s2250_s30 = scalar_lea.vmem %s2249_s10, 1024  ;;  %p2251_p5 = scmp.lt.s32.totalorder %s2880_s20, %s2249_s10 }
  0x7f   : > { %1510 = vmatmul.mubr.msk.f32.vlgmr.msra.gmra.mrb[0].mxu0 %vm398_vm0, %v371_v11  ;;  %v380_v28 = vld [vmem:[#allocation6 + $0x28] sm:$0xff]  ;;  %v2643_v32 = vpack.c.bf16 %v612_v26, %v609_v23  ;;  %v373_v33 = vld [vmem:[%s2609_s13 + $0x10] sm:$0xff]  ;;  %v602_v35 = vld [vmem:[#allocation8 + $0x28] sm:$0xff] }
  0x80   : > { %1773 = vmatpush1.bf16.msra.mxu0 %v2627_v16  ;;  %481 = vmatprep.mubr.f32.mxu0 %v2370_v6  ;;  %v616_v29 = vld [vmem:[#allocation8 + $0x98] sm:$0xff]  ;;  %v1766_v31 = vpack.c.bf16 %v380_v28, %v377_v27  ;;  %v615_v37 = vld [vmem:[#allocation8 + $0x90] sm:$0xff]  ;;  %v618_v38 = vld [vmem:[#allocation8 + $0xa8] sm:$0xff]  ;;  %v2649_v39 = vpack.c.bf16 %v602_v35, %v599_v34 }
  0x81   : > { %1775 = vmatprep.subr.bf16.mxu0 %v2630_v17  ;;  %v2647_v36 = vpack.c.bf16 %v619_v30, %v616_v29  ;;  %v622_v40 = vld [vmem:[#allocation8 + $0xc8] sm:$0xff]  ;;  %v625_v41 = vld [vmem:[#allocation8 + $0xe0] sm:$0xff]  ;;  %v608_v44 = vld [vmem:[#allocation8 + $0x58] sm:$0xff]  ;;  %v2655_v45 = vpack.c.bf16 %v618_v38, %v615_v37 }
  0x82   : > { %1767 = vmatprep.subr.bf16.mxu1 %v1766_v31  ;;  %v605_v43 = vld [vmem:[#allocation8 + $0x40] sm:$0xff]  ;;  %v374_v46 = vld [vmem:[%s2609_s13 + $0x18] sm:$0xff]  ;;  %v2660_v47 = vpack.c.bf16 %v625_v41, %v622_v40  ;;  %v624_v49 = vld [vmem:[#allocation8 + $0xd8] sm:$0xff]  ;;  %s2244_s13 = scalar_lea.vmem %s2880_s20, 512 }
  0x83   : > { %1511 = vmatmul.mubr.msk.f32.gmra.mrb[2].mxu0 %vm398_vm0, %v372_v24  ;;  %1769 = vmatpush3.bf16.msra.mxu1 %v1766_v31  ;;  %v621_v48 = vld [vmem:[#allocation8 + $0xc0] sm:$0xff]  ;;  %v628_v50 = vld [vmem:[#allocation8 + $0xf8] sm:$0xff]  ;;  %v2663_v51 = vpack.c.bf16 %v608_v44, %v605_v43  ;;  %v631_v52 = vld [vmem:[#allocation8 + $0x110] sm:$0xff]  ;;  %v383_v31 = vlaneseq  ;;  %p2245_p11 = scmp.ne.s32.totalorder %s2880_s20, %s2244_s13  ;;  %p2252_p9 = scmp.lt.s32.totalorder %s2250_s30, %s2244_s13 }
  0x84   : > { %1777 = vmatpush1.bf16.msra.mxu0 %v2634_v22  ;;  %487 = vmatprep.mubr.f32.mxu0 %v2370_v6  ;;  %v611_v53 = vld [vmem:[#allocation8 + $0x70] sm:$0xff]  ;;  %v614_v54 = vld [vmem:[#allocation8 + $0x88] sm:$0xff]  ;;  %v2670_v55 = vpack.c.bf16 %v624_v49, %v621_v48  ;;  %v2674_v56 = vpack.c.bf16 %v631_v52, %v628_v50  ;;  %v637_v61 = vld [vmem:[#allocation8 + $0x140] sm:$0xff] }
  0x85   : > { %1779 = vmatprep.subr.bf16.mxu0 %v2639_v25  ;;  %1802 = vmatprep.subr.bf16.mxu1 %v2371_v42  ;;  %v627_v57 = vld [vmem:[#allocation8 + $0xf0] sm:$0xff]  ;;  %v630_v58 = vld [vmem:[#allocation8 + $0x108] sm:$0xff]  ;;  %v2677_v60 = vpack.c.bf16 %v614_v54, %v611_v53  ;;  %v617_v62 = vld [vmem:[#allocation8 + $0xa0] sm:$0xff]  ;;  %p2246_p4 = pnand %p2245_p11, %p2985_p0  ;;  %p2253_p12 = por %p2252_p9, %p2251_p5 }
  0x86   : > { %1617 = vmatmul.mubr.msk.f32.vlgmr.msra.gmra.mrb[0].mxu1 %vm398_vm0, %v372_v24  ;;  %v634_v59 = vld [vmem:[#allocation8 + $0x128] sm:$0xff]  ;;  %v620_v63 = vld [vmem:[#allocation8 + $0xb8] sm:$0xff]  ;;  %v2684_v0 = vpack.c.bf16 %v630_v58, %v627_v57  ;;  %v633_v2 = vld [vmem:[#allocation8 + $0x120] sm:$0xff] }
  0x87   : > { %1512 = vmatmul.mubr.msk.f32.gmra.mrb[4].mxu0 %vm398_vm0, %v373_v33  ;;  %1804 = vmatpush3.bf16.msra.mxu1 %v2649_v39  ;;  %v2687_v1 = vpack.c.bf16 %v637_v61, %v634_v59  ;;  %v636_v3 = vld [vmem:[#allocation8 + $0x138] sm:$0xff]  ;;  %v2690_v5 = vpack.c.bf16 %v620_v63, %v617_v62  ;;  %v643_v7 = vld [vmem:[#allocation8 + $0x170] sm:$0xff]  ;;  %v626_v9 = vld [vmem:[#allocation8 + $0xe8] sm:$0xff]  ;;  %p2247_p3 = pneg %p2246_p4 }
  0x88   : > { %1781 = vmatpush1.bf16.msra.mxu0 %v2643_v32  ;;  %493 = vmatprep.mubr.f32.mxu0 %v2370_v6  ;;  %v640_v4 = vld [vmem:[#allocation8 + $0x158] sm:$0xff]  ;;  %v623_v8 = vld [vmem:[#allocation8 + $0xd0] sm:$0xff]  ;;  %v2694_v11 = vpack.c.bf16 %v636_v3, %v633_v2  ;;  %v642_v14 = vld [vmem:[#allocation8 + $0x168] sm:$0xff] }
  0x89   : > { %1783 = vmatprep.subr.bf16.mxu0 %v2647_v36  ;;  %1805 = vmatprep.subr.bf16.mxu1 %v2371_v42  ;;  %v2697_v12 = vpack.c.bf16 %v643_v7, %v640_v4  ;;  %v639_v13 = vld [vmem:[#allocation8 + $0x150] sm:$0xff]  ;;  %v2700_v15 = vpack.c.bf16 %v626_v9, %v623_v8  ;;  %v629_v18 = vld [vmem:[#allocation8 + $0x100] sm:$0xff]  ;;  %v632_v19 = vld [vmem:[#allocation8 + $0x118] sm:$0xff]  ;;  %p2254_p1 = pnand %p2253_p12, %p2247_p3 }
  0x8a   : > { %1619 = vmatprep.mubr.msk.f32.mxu1 %vm398_vm0, %v373_v33  ;;  %v2704_v20 = vpack.c.bf16 %v642_v14, %v639_v13  ;;  %v2708_v21 = vpack.c.bf16 %v632_v19, %v629_v18  ;;  %v635_v23 = vld [vmem:[#allocation8 + $0x130] sm:$0xff]  ;;  %v638_v24 = vld [vmem:[#allocation8 + $0x148] sm:$0xff]  ;;  %v2712_v26 = vld [vmem:[#allocation10] sm:$0xff]  ;;  %v384_v33 = vshrl.u32 %v383_v31, 7 }
  0x8b   : > { %1513 = vmatmul.mubr.msk.f32.gmra.mrb[6].mxu0 %vm398_vm0, %v374_v46  ;;  %1807 = vmatpush3.bf16.msra.mxu1 %v2663_v51  ;;  %v2715_v27 = vpack.c.bf16 %v638_v24, %v635_v23  ;;  %v641_v28 = vld [vmem:[#allocation8 + $0x160] sm:$0xff]  ;;  %v644_v29 = vld [vmem:[#allocation8 + $0x178] sm:$0xff]  ;;  %v381_v35 = vld [vmem:[%s2963_s4] sm:$0x7] }
  0x8c   : > { %1785 = vmatpush1.bf16.msra.mxu0 %v2655_v45  ;;  %730 = vmatprep.mubr.f32.mxu0 %v2370_v6  ;;  %v2723_v30 = vpack.c.bf16 %v644_v29, %v641_v28  ;;  %v393_v34 = vsub.s32 2, %v384_v33  ;;  %v385_v49 = vsub.s32 0, %v384_v33  ;;  %v645_v50 = vld [vmem:[%s2964_s5] sm:$0x7]  ;;  %v389_v52 = vsub.s32 1, %v384_v33 }
  0x8d   : > { %1787 = vmatprep.subr.bf16.mxu0 %v2660_v47  ;;  %1808 = vmatprep.subr.bf16.mxu1 %v2371_v42 }
  0x8e   : > { %1620 = vmatmul.mubr.msk.f32.gmra.mrb[2].mxu1 %vm398_vm0, %v374_v46  ;;  %v394_v37 = vrot.slane %v381_v35, %v393_v34  ;;  %v386_v53 = vrot.slane %v381_v35, %v385_v49  ;;  %v650_v54 = vrot.slane %v645_v50, %v385_v49  ;;  %v390_v57 = vrot.slane %v381_v35, %v389_v52 }
  0x8f   : > { %1654 = vmatprep.mubr.msk.f32.mxu1 %vm2372_vm1, %v2370_v6  ;;  %1810 = vmatpush3.bf16.msra.mxu1 %v2677_v60  ;;  %v654_v58 = vrot.slane %v645_v50, %v389_v52  ;;  %v2780_v18 = vrot.slane %v645_v50, %v393_v34 }
  0x90   : > { %1789 = vmatpush1.bf16.msra.mxu0 %v2670_v55  ;;  %1811 = vmatprep.subr.bf16.mxu1 %v2371_v42  ;;  %v2774_v59 = vadd.f32 %v650_v54, %v386_v53 }
  0x91   : > { %1791 = vmatprep.subr.bf16.mxu0 %v2674_v56  ;;  %v2776_v62 = vadd.f32 %v654_v58, %v390_v57 }
  0x93   : > { %1813 = vmatpush3.bf16.msra.mxu1 %v2690_v5 }
  0x94   : > { %1793 = vmatpush1.bf16.msra.mxu0 %v2684_v0  ;;  %1814 = vmatprep.subr.bf16.mxu1 %v2371_v42 }
  0x95   : > { %1795 = vmatprep.subr.bf16.mxu0 %v2687_v1 }
  0x97   : > { %1816 = vmatpush3.bf16.msra.mxu1 %v2700_v15 }
  0x98   : > { %1797 = vmatpush1.bf16.msra.mxu0 %v2694_v11  ;;  %1817 = vmatprep.subr.bf16.mxu1 %v2371_v42 }
  0x99   : > { %1799 = vmatprep.subr.bf16.mxu0 %v2697_v12 }
  0x9b   : > { %1819 = vmatpush3.bf16.msra.mxu1 %v2708_v21 }
  0x9c   : > { %1801 = vmatpush1.bf16.msra.mxu0 %v2704_v20  ;;  %1820 = vmatprep.subr.bf16.mxu1 %v2371_v42 }
  0x9d   : > { %1827 = vmatprep.subr.bf16.mxu0 %v2623_v10 }
  0x9f   : > { %731 = vmatmul.mubr.f32.vlgmr.msra.gmra.mrb[0].mxu0 %v2712_v26  ;;  %1822 = vmatpush3.bf16.msra.mxu1 %v2715_v27 }
  0xa0   : > { %1829 = vmatpush1.bf16.msra.mxu0 %v2627_v16  ;;  %897 = vmatprep.mubr.f32.mxu0 %v2370_v6 }
  0xa1   : > { %1831 = vmatprep.subr.bf16.mxu0 %v2630_v17  ;;  %1823 = vmatprep.subr.bf16.mxu1 %v2371_v42 }
  0xa3   : > { %1825 = vmatpush3.bf16.msra.mxu1 %v2723_v30 }
  0xa4   : > { %1833 = vmatpush1.bf16.msra.mxu0 %v2634_v22  ;;  %1858 = vmatprep.subr.bf16.mxu1 %v2371_v42 }
  0xa5   : > { %1835 = vmatprep.subr.bf16.mxu0 %v2639_v25 }
  0xa6   : > { %1655 = vmatmul.mubr.f32.vlgmr.msra.gmra.mrb[4].mxu1 %v2712_v26 }
  0xa7   : > { %1860 = vmatpush3.bf16.msra.mxu1 %v2649_v39  ;;  %1689 = vmatprep.mubr.msk.f32.mxu1 %vm2372_vm1, %v2370_v6 }
  0xa8   : > { %1837 = vmatpush1.bf16.msra.mxu0 %v2643_v32  ;;  %1861 = vmatprep.subr.bf16.mxu1 %v2371_v42 }
  0xa9   : > { %1839 = vmatprep.subr.bf16.mxu0 %v2647_v36 }
  0xab   : > { %1863 = vmatpush3.bf16.msra.mxu1 %v2663_v51 }
  0xac   : > { %1841 = vmatpush1.bf16.msra.mxu0 %v2655_v45  ;;  %1864 = vmatprep.subr.bf16.mxu1 %v2371_v42 }
  0xad   : > { %1843 = vmatprep.subr.bf16.mxu0 %v2660_v47 }
  0xaf   : > { %1866 = vmatpush3.bf16.msra.mxu1 %v2677_v60 }
  0xb0   : > { %1845 = vmatpush1.bf16.msra.mxu0 %v2670_v55  ;;  %1867 = vmatprep.subr.bf16.mxu1 %v2371_v42 }
  0xb1   : > { %1847 = vmatprep.subr.bf16.mxu0 %v2674_v56 }
  0xb3   : > { %1869 = vmatpush3.bf16.msra.mxu1 %v2690_v5 }
  0xb4   : > { %1849 = vmatpush1.bf16.msra.mxu0 %v2684_v0  ;;  %1870 = vmatprep.subr.bf16.mxu1 %v2371_v42 }
  0xb5   : > { %1851 = vmatprep.subr.bf16.mxu0 %v2687_v1 }
  0xb7   : > { %1872 = vmatpush3.bf16.msra.mxu1 %v2700_v15 }
  0xb8   : > { %1853 = vmatpush1.bf16.msra.mxu0 %v2694_v11  ;;  %1873 = vmatprep.subr.bf16.mxu1 %v2371_v42 }
  0xb9   : > { %1855 = vmatprep.subr.bf16.mxu0 %v2697_v12 }
  0xbb   : > { %1875 = vmatpush3.bf16.msra.mxu1 %v2708_v21 }
  0xbc   : > { %1857 = vmatpush1.bf16.msra.mxu0 %v2704_v20  ;;  %1876 = vmatprep.subr.bf16.mxu1 %v2371_v42 }
  0xbd   : > { %1883 = vmatprep.subr.bf16.mxu0 %v2623_v10 }
  0xbf   : > { %1878 = vmatpush3.bf16.msra.mxu1 %v2715_v27 }
  0xc0   : > { %1879 = vmatprep.subr.bf16.mxu1 %v2371_v42 }
  0xc3   : > { %1881 = vmatpush3.bf16.msra.mxu1 %v2723_v30 }
  0xc4   : > { %1914 = vmatprep.subr.bf16.mxu1 %v2371_v42 }
 0x159   : > { %v1618_v38 = vpop.f32.mrb[0].mxu1 }
 0x15a   : > { %v2765_v40 = vadd.f32 %v1618_v38, %v394_v37  ;;  %v566_v41 = vpop.f32.mrb[1].mxu1 }
 0x15b   : > { %v567_v29 = vadd.f32 %v566_v41, %v394_v37 }
 0x161   : > { %v1621_v43 = vpop.f32.mrb[2].mxu1 }
 0x162   : > { %v2767_v44 = vadd.f32 %v1621_v43, %v394_v37  ;;  %v576_v46 = vpop.f32.mrb[3].mxu1 }
 0x163   : > { %v2769_v48 = vadd.f32 %v576_v46, %v394_v37 }
 0x172   : > { %v732_v61 = vpop.f32.mrb[0].mxu0 }
 0x173   : > { %v1995_v63 = vadd.f32 %v2774_v59, %v732_v61  ;;  %v734_v2 = vpop.f32.mrb[1].mxu0 }
 0x174   : > { %v1997_v4 = vadd.f32 %v2776_v62, %v734_v2 }
 0x175   : > { %v1518_v3 = vmul.f32 -1.442695, %v1995_v63 }
 0x176   : > { %v1519_v7 = vmul.f32 -1.442695, %v1997_v4 }
 0x177   : > { %2118 = vpow2.f32 %v1518_v3 }
 0x178   : > { %2120 = vpow2.f32 %v1519_v7 }
 0x179   : > { %v803_v8 = vpop.f32.mrb[4].mxu1 }
 0x17a   : > { %v1656_v9 = vpop.f32.mrb[5].mxu1  ;;  %v804_v24 = vadd.f32 %v803_v8, %v2780_v18 }
 0x181   : > { %v2119_v13 = vpop.eup %2118 }
 0x182   : > { %v811_v14 = vadd.f32 1.0, %v2119_v13  ;;  %v2121_v19 = vpop.eup %2120 }
 0x183   : > { %v818_v23 = vadd.f32 1.0, %v2121_v19 }
 0x184   : > { %2122 = vrcp.f32 %v811_v14 }
 0x185   : > { %2124 = vrcp.f32 %v818_v23 }
 0x18e   : > { %v2123_v28 = vpop.eup %2122 }
 0x18f   : > { %v821_v31 = vmul.f32 %v2123_v28, %v804_v24  ;;  %v2125_v35 = vpop.eup %2124 }
 0x190   : > { %v824_v38 = vsub.f32 1.0, %v2125_v35  ;;  %v826_v49 = vmul.f32 %v2125_v35, %v2712_v26 }
 0x191   : > { %v822_v33 = vadd.f32 %v821_v31, %v567_v29 }
 0x193   : > { %2126 = vtanh.f32 %v822_v33 }
 0x19d   : > { %v2127_v43 = vpop.eup %2126 }
 0x19e   : > { %v825_v46 = vmul.f32 %v2127_v43, %v824_v38 }
 0x1a0   : > { %v2784_v52 = vadd.f32 %v826_v49, %v825_v46 }
 0x1a2   : > { %828 = vst [vmem:[%s2619_s12] sm:$0xff] %v2784_v52  ;;  %898 = vmatmul.mubr.f32.vlgmr.msra.gmra.mrb[2].mxu0 %v2784_v52  ;;  %1690 = vmatmul.mubr.f32.vlgmr.msra.gmra.mrb[6].mxu1 %v2784_v52 }
 0x1a3   : > { %1885 = vmatpush1.bf16.msra.mxu0 %v2627_v16  ;;  %1916 = vmatpush3.bf16.msra.mxu1 %v2649_v39 }
 0x1a4   : > { %1887 = vmatprep.subr.bf16.mxu0 %v2630_v17  ;;  %1917 = vmatprep.subr.bf16.mxu1 %v2371_v42 }
 0x1a5   : > { %1065 = vmatprep.mubr.f32.mxu0 %v2370_v6  ;;  %1724 = vmatprep.mubr.msk.f32.mxu1 %vm2372_vm1, %v2370_v6 }
 0x1a7   : > { %1889 = vmatpush1.bf16.msra.mxu0 %v2634_v22  ;;  %1919 = vmatpush3.bf16.msra.mxu1 %v2663_v51 }
 0x1a8   : > { %1891 = vmatprep.subr.bf16.mxu0 %v2639_v25  ;;  %1920 = vmatprep.subr.bf16.mxu1 %v2371_v42 }
 0x1ab   : > { %1893 = vmatpush1.bf16.msra.mxu0 %v2643_v32  ;;  %1922 = vmatpush3.bf16.msra.mxu1 %v2677_v60 }
 0x1ac   : > { %1895 = vmatprep.subr.bf16.mxu0 %v2647_v36  ;;  %1923 = vmatprep.subr.bf16.mxu1 %v2371_v42 }
 0x1af   : > { %1897 = vmatpush1.bf16.msra.mxu0 %v2655_v45  ;;  %1925 = vmatpush3.bf16.msra.mxu1 %v2690_v5 }
 0x1b0   : > { %1899 = vmatprep.subr.bf16.mxu0 %v2660_v47  ;;  %1926 = vmatprep.subr.bf16.mxu1 %v2371_v42 }
 0x1b3   : > { %1901 = vmatpush1.bf16.msra.mxu0 %v2670_v55  ;;  %1928 = vmatpush3.bf16.msra.mxu1 %v2700_v15 }
 0x1b4   : > { %1903 = vmatprep.subr.bf16.mxu0 %v2674_v56  ;;  %1929 = vmatprep.subr.bf16.mxu1 %v2371_v42 }
 0x1b7   : > { %1905 = vmatpush1.bf16.msra.mxu0 %v2684_v0  ;;  %1931 = vmatpush3.bf16.msra.mxu1 %v2708_v21 }
 0x1b8   : > { %1907 = vmatprep.subr.bf16.mxu0 %v2687_v1  ;;  %1932 = vmatprep.subr.bf16.mxu1 %v2371_v42 }
 0x1bb   : > { %1909 = vmatpush1.bf16.msra.mxu0 %v2694_v11  ;;  %1934 = vmatpush3.bf16.msra.mxu1 %v2715_v27 }
 0x1bc   : > { %1911 = vmatprep.subr.bf16.mxu0 %v2697_v12  ;;  %1935 = vmatprep.subr.bf16.mxu1 %v2371_v42 }
 0x1bf   : > { %1913 = vmatpush1.bf16.msra.mxu0 %v2704_v20  ;;  %1937 = vmatpush3.bf16.msra.mxu1 %v2723_v30 }
 0x1c0   : > { %1939 = vmatprep.subr.bf16.mxu0 %v2623_v10  ;;  %1970 = vmatprep.subr.bf16.mxu1 %v2371_v42 }
 0x275   : > { %v899_v26 = vpop.f32.mrb[2].mxu0  ;;  %v970_v34 = vpop.f32.mrb[6].mxu1 }
 0x276   : > { %v1999_v37 = vadd.f32 %v2774_v59, %v899_v26  ;;  %v901_v41 = vpop.f32.mrb[3].mxu0  ;;  %v1691_v50 = vpop.f32.mrb[7].mxu1  ;;  %v971_v2 = vadd.f32 %v970_v34, %v2780_v18 }
 0x277   : > { %v2001_v54 = vadd.f32 %v2776_v62, %v901_v41 }
 0x278   : > { %v1520_v53 = vmul.f32 -1.442695, %v1999_v37 }
 0x279   : > { %v1521_v57 = vmul.f32 -1.442695, %v2001_v54 }
 0x27a   : > { %2128 = vpow2.f32 %v1520_v53 }
 0x27b   : > { %2130 = vpow2.f32 %v1521_v57 }
 0x284   : > { %v2129_v58 = vpop.eup %2128 }
 0x285   : > { %v978_v61 = vadd.f32 1.0, %v2129_v58  ;;  %v2131_v63 = vpop.eup %2130 }
 0x286   : > { %v985_v10 = vadd.f32 1.0, %v2131_v63 }
 0x287   : > { %2132 = vrcp.f32 %v978_v61 }
 0x288   : > { %2134 = vrcp.f32 %v985_v10 }
 0x291   : > { %v2133_v3 = vpop.eup %2132 }
 0x292   : > { %v988_v4 = vmul.f32 %v2133_v3, %v971_v2  ;;  %v2135_v8 = vpop.eup %2134 }
 0x293   : > { %v991_v9 = vsub.f32 1.0, %v2135_v8  ;;  %v993_v19 = vmul.f32 %v2135_v8, %v2784_v52 }
 0x294   : > { %v989_v7 = vadd.f32 %v988_v4, %v2765_v40 }
 0x296   : > { %2136 = vtanh.f32 %v989_v7 }
 0x2a0   : > { %v2137_v13 = vpop.eup %2136 }
 0x2a1   : > { %v992_v14 = vmul.f32 %v2137_v13, %v991_v9 }
 0x2a3   : > { %v994_v23 = vadd.f32 %v993_v19, %v992_v14 }
 0x2a5   : > { %1522 = vst [vmem:[%s2619_s12 + $0x8] sm:$0xff] %v994_v23  ;;  %1066 = vmatmul.mubr.f32.vlgmr.msra.gmra.mrb[4].mxu0 %v994_v23  ;;  %1725 = vmatmul.mubr.f32.vlgmr.msra.gmra.mrb[8].mxu1 %v994_v23 }
 0x2a6   : > { %1941 = vmatpush1.bf16.msra.mxu0 %v2627_v16  ;;  %1972 = vmatpush3.bf16.msra.mxu1 %v2649_v39 }
 0x2a7   : > { %1943 = vmatprep.subr.bf16.mxu0 %v2630_v17  ;;  %1973 = vmatprep.subr.bf16.mxu1 %v2371_v42 }
 0x2a8   : > { %1233 = vmatprep.mubr.f32.mxu0 %v2370_v6  ;;  %1759 = vmatprep.mubr.msk.f32.mxu1 %vm2372_vm1, %v2370_v6 }
 0x2aa   : > { %1945 = vmatpush1.bf16.msra.mxu0 %v2634_v22  ;;  %1975 = vmatpush3.bf16.msra.mxu1 %v2663_v51 }
 0x2ab   : > { %1947 = vmatprep.subr.bf16.mxu0 %v2639_v25  ;;  %1976 = vmatprep.subr.bf16.mxu1 %v2371_v42 }
 0x2ae   : > { %1949 = vmatpush1.bf16.msra.mxu0 %v2643_v32  ;;  %1978 = vmatpush3.bf16.msra.mxu1 %v2677_v60 }
 0x2af   : > { %1951 = vmatprep.subr.bf16.mxu0 %v2647_v36  ;;  %1979 = vmatprep.subr.bf16.mxu1 %v2371_v42 }
 0x2b2   : > { %1953 = vmatpush1.bf16.msra.mxu0 %v2655_v45  ;;  %1981 = vmatpush3.bf16.msra.mxu1 %v2690_v5 }
 0x2b3   : > { %1955 = vmatprep.subr.bf16.mxu0 %v2660_v47  ;;  %1982 = vmatprep.subr.bf16.mxu1 %v2371_v42 }
 0x2b6   : > { %1957 = vmatpush1.bf16.msra.mxu0 %v2670_v55  ;;  %1984 = vmatpush3.bf16.msra.mxu1 %v2700_v15 }
 0x2b7   : > { %1959 = vmatprep.subr.bf16.mxu0 %v2674_v56  ;;  %1985 = vmatprep.subr.bf16.mxu1 %v2371_v42 }
 0x2ba   : > { %1961 = vmatpush1.bf16.msra.mxu0 %v2684_v0  ;;  %1987 = vmatpush3.bf16.msra.mxu1 %v2708_v21 }
 0x2bb   : > { %1963 = vmatprep.subr.bf16.mxu0 %v2687_v1  ;;  %1988 = vmatprep.subr.bf16.mxu1 %v2371_v42 }
 0x2be   : > { %1965 = vmatpush1.bf16.msra.mxu0 %v2694_v11  ;;  %1990 = vmatpush3.bf16.msra.mxu1 %v2715_v27 }
 0x2bf   : > { %1967 = vmatprep.subr.bf16.mxu0 %v2697_v12  ;;  %1991 = vmatprep.subr.bf16.mxu1 %v2371_v42 }
 0x2c2   : > { %1969 = vmatpush1.bf16.msra.mxu0 %v2704_v20  ;;  %1993 = vmatpush3.bf16.msra.mxu1 %v2723_v30 }
 0x378   : > { %v1067_v6 = vpop.f32.mrb[4].mxu0  ;;  %v1138_v16 = vpop.f32.mrb[8].mxu1 }
 0x379   : > { %v2003_v17 = vadd.f32 %v2774_v59, %v1067_v6  ;;  %v1069_v22 = vpop.f32.mrb[5].mxu0  ;;  %v1726_v25 = vpop.f32.mrb[9].mxu1  ;;  %v1139_v55 = vadd.f32 %v1138_v16, %v2780_v18 }
 0x37a   : > { %v2005_v36 = vadd.f32 %v2776_v62, %v1069_v22 }
 0x37b   : > { %v1523_v32 = vmul.f32 -1.442695, %v2003_v17 }
 0x37c   : > { %v1524_v39 = vmul.f32 -1.442695, %v2005_v36 }
 0x37d   : > { %2138 = vpow2.f32 %v1523_v32 }
 0x37e   : > { %2140 = vpow2.f32 %v1524_v39 }
 0x387   : > { %v2139_v45 = vpop.eup %2138 }
 0x388   : > { %v1146_v47 = vadd.f32 1.0, %v2139_v45  ;;  %v2141_v42 = vpop.eup %2140 }
 0x389   : > { %v1153_v51 = vadd.f32 1.0, %v2141_v42 }
 0x38a   : > { %2142 = vrcp.f32 %v1146_v47 }
 0x38b   : > { %2144 = vrcp.f32 %v1153_v51 }
 0x394   : > { %v2143_v56 = vpop.eup %2142 }
 0x395   : > { %v1156_v60 = vmul.f32 %v2143_v56, %v1139_v55  ;;  %v2145_v1 = vpop.eup %2144 }
 0x396   : > { %v1159_v5 = vsub.f32 1.0, %v2145_v1  ;;  %v1161_v15 = vmul.f32 %v2145_v1, %v994_v23 }
 0x397   : > { %v1157_v0 = vadd.f32 %v1156_v60, %v2769_v48 }
 0x399   : > { %2146 = vtanh.f32 %v1157_v0 }
 0x3a3   : > { %v2147_v11 = vpop.eup %2146 }
 0x3a4   : > { %v1160_v12 = vmul.f32 %v2147_v11, %v1159_v5 }
 0x3a6   : > { %v1162_v20 = vadd.f32 %v1161_v15, %v1160_v12 }
 0x3a8   : > { %1525 = vst [vmem:[%s2619_s12 + $0x10] sm:$0xff] %v1162_v20  ;;  %1234 = vmatmul.mubr.f32.vlgmr.msra.gmra.mrb[6].mxu0 %v1162_v20  ;;  %1760 = vmatmul.mubr.f32.vlgmr.msra.gmra.mrb[10].mxu1 %v1162_v20 }
 0x47b   : > { %v1235_v21 = vpop.f32.mrb[6].mxu0  ;;  %v1306_v27 = vpop.f32.mrb[10].mxu1 }
 0x47c   : > { %v2007_v30 = vadd.f32 %v2774_v59, %v1235_v21  ;;  %v1237_v40 = vpop.f32.mrb[7].mxu0  ;;  %v1761_v24 = vpop.f32.mrb[11].mxu1  ;;  %v1307_v43 = vadd.f32 %v1306_v27, %v2780_v18 }
 0x47d   : > { %v2009_v29 = vadd.f32 %v2776_v62, %v1237_v40 }
 0x47e   : > { %v1526_v28 = vmul.f32 -1.442695, %v2007_v30 }
 0x47f   : > { %v1527_v48 = vmul.f32 -1.442695, %v2009_v29 }
 0x480   : > { %2148 = vpow2.f32 %v1526_v28 }
 0x481   : > { %2150 = vpow2.f32 %v1527_v48 }
 0x48a   : > { %v2149_v31 = vpop.eup %2148 }
 0x48b   : > { %v1314_v33 = vadd.f32 1.0, %v2149_v31  ;;  %v2151_v35 = vpop.eup %2150 }
 0x48c   : > { %v1321_v38 = vadd.f32 1.0, %v2151_v35 }
 0x48d   : > { %2152 = vrcp.f32 %v1314_v33 }
 0x48e   : > { %2154 = vrcp.f32 %v1321_v38 }
 0x497   : > { %v2153_v46 = vpop.eup %2152 }
 0x498   : > { %v1324_v49 = vmul.f32 %v2153_v46, %v1307_v43  ;;  %v2155_v62 = vpop.eup %2154 }
 0x499   : > { %v1327_v52 = vsub.f32 1.0, %v2155_v62  ;;  %v1329_v37 = vmul.f32 %v2155_v62, %v1162_v20 }
 0x49a   : > { %v1325_v59 = vadd.f32 %v1324_v49, %v2767_v44 }
 0x49c   : > { %2156 = vtanh.f32 %v1325_v59 }
 0x4a6   : > { %v2157_v26 = vpop.eup %2156 }
 0x4a7   : > { %v1328_v34 = vmul.f32 %v2157_v26, %v1327_v52 }
 0x4a9   : > { %v1330_v44 = vadd.f32 %v1329_v37, %v1328_v34 }
 0x4ab   : > { %1528 = vst [vmem:[%s2619_s12 + $0x18] sm:$0xff] %v1330_v44  ;;  %1333 = vst [vmem:[#allocation10] sm:$0xff] %v1330_v44 }
 0x4ac   : > { %2257 = shalt.err (!%p2254_p1)
}
 0x4ad   : > { %s2258_s12 = scalar_lea.hbm %s2878_s17, 512  ;;  %s2262_s29 = scalar_lea.hbm %s2965_s6, 1024 }
 0x4ae   : > { %p2259_p13 = scmp.ne.s32.totalorder %s2878_s17, %s2258_s12  ;;  %p2263_p2 = scmp.lt.u32.totalorder %s2878_s17, %s2965_s6 }
 0x4af   : > { %p2264_p7 = scmp.lt.u32.totalorder %s2262_s29, %s2258_s12  ;;  %p2266_p11 = scmp.lt.u32.totalorder %s2258_s12, %s2878_s17 }
 0x4b0   : > { %p2260_p6 = pnand %p2259_p13, %p2985_p0 }
 0x4b1   : > { %p2265_p8 = por %p2264_p7, %p2263_p2 }
 0x4b2   : > { %p2261_p10 = pneg %p2260_p6 }
 0x4b3   : > { %p2267_p4 = por %p2266_p11, %p2265_p8 }
 0x4b5   : > { %p2268_p3 = pnand %p2267_p4, %p2261_p10 }
 0x4b7   : > { %2271 = shalt.err (!%p2268_p3)
}
 0x4b8   : > { %s2375_s13 = smov 128   ;;  %s2376_s8 = smov 8  }
 0x4b9   : > { %2028 = dma.vmem_to_hbm [thread:$0]  (%p2985_p0), %s2880_s20, 512, %s2878_s17, %s1335_s26, %s2375_s13, %s2375_s13, %s2376_s8  }
 0x4ba   : > { %s2272_s10 = scalar_lea.vmem %s2882_s21, 128  ;;  %p2986_p9 = scmp.ne.s32.totalorder %s2975_s9, 0 }
 0x4bb   : > { %p2273_p5 = scmp.ne.s32.totalorder %s2882_s21, %s2272_s10  ;;  %p2279_p13 = scmp.lt.s32.totalorder %s2882_s21, %s2882_s21 }
 0x4bc   : > { %p2280_p6 = scmp.lt.s32.totalorder %s2272_s10, %s2272_s10 }
 0x4bd   : > { %p2274_p12 = pnand %p2273_p5, %p2986_p9 }
 0x4be   : > { %p2281_p10 = por %p2280_p6, %p2279_p13 }
 0x4bf   : > { %p2275_p1 = pneg %p2274_p12 }
 0x4c1   : > { %p2282_p2 = pnand %p2281_p10, %p2275_p1 }
 0x4c3   : > { %2285 = shalt.err (!%p2282_p2)
}
 0x4c4   : > { %s2286_s11 = scalar_lea.hbm %s2966_s7, 128 }
 0x4c5   : > { %p2287_p0 = scmp.ne.s32.totalorder %s2966_s7, %s2286_s11  ;;  %p2292_p11 = scmp.lt.u32.totalorder %s2286_s11, %s2966_s7 }
 0x4c7   : > { %p2288_p7 = pnand %p2287_p0, %p2986_p9 }
 0x4c9   : > { %p2289_p8 = pneg %p2288_p7 }
 0x4cb   : > { %p2294_p4 = pnand %p2292_p11, %p2289_p8 }
 0x4cd   : > { %2297 = shalt.err (!%p2294_p4)
}
 0x4ce   : > { %2030 = dma.vmem_to_hbm [thread:$0]  (%p2986_p9), %s2882_s21, 128, %s2966_s7, [#allocation11]  }
 0x4cf   : > { %2331 = dma.done.wait (%p2986_p9), [#allocation11], 128  }
 0x4d0   : > { %2333 = vsyncadd (%p2986_p9), [#allocation11], 4294967168 }
 0x4d1 PF: > { %s2987_s29 = sld [smem:[#allocation16_spill]]  ;;  %s1381_s0 = sand.u32 1, %s2340_s23  }
 0x4d2   : > { %p2989_p5 = scmp.ge.s32.totalorder %s2360_s28, 2  ;;  %s1382_s22 = scalar_lea.sflag [#allocation5], %s1381_s0 }
 0x4d7   : > { %p2988_p3 = scmp.ne.s32.totalorder %s2987_s29, 0 }
 0x4d9   : > { %p2046_p12 = pnand %p2989_p5, %p2988_p3 }
 0x4db   : > { %2335 = dma.done.wait (!%p2046_p12), %s1382_s22, 512  }
 0x4dc   : > { %2337 = vsyncadd (!%p2046_p12), %s1382_s22, 4294966784  ;;  %s26_s28 = sadd.s32 1, %s2360_s28   ;;  %s2990_s23 = smov %s2344_s24 }
 0x4dd   : > { %p23_p1 = scmp.ge.s32.totalorder %s26_s28, 4   ;;  %s2991_s24 = smov %s2348_s25 }
 0x4de   : > { %s2992_s25 = smov %s2559_s16  ;;  %s2993_s26 = smov %s2356_s27 }
 0x4df   : > { %s2994_s27 = smov %s2996_s19  ;;  %25 = sbr.rel (!%p23_p1) target bundleno = 8 (0x8), region = 119 }
 0x4e6   :  { %1387 = vsyncpa [#allocation4], 1 }
 0x4e7   :  { %1389 = vsyncpa [#allocation4 + $0x1], 1 }
 0x4e8   :  { %1390 = vsyncpa [#allocation7], 1 }
 0x4e9   :  { %1391 = vsyncpa [#allocation5], 1 }
 0x4ea   :  { %1393 = vsyncpa [#allocation5 + $0x1], 1 }
 0x4eb   :  { %1394 = vsyncpa [#allocation11], 1 }

</bundles_post_ra>
